<compile_context>
chip_gen: v6e
topology: v6e:2x2x1
jax: 0.10.0
libtpu: 0.0.40
codegen_flags: <defaults>
</compile_context>

<pallas_src>
import jax
import jax.numpy as jnp
from jax.experimental import pallas as pl
from jax.experimental.pallas import tpu as pltpu

L1_SIZE = 20
L2_SIZE = 10
NEG_SLOPE = 0.01  # F.leaky_relu default


def _leaky_relu(x):
    return jnp.where(x > 0, x, NEG_SLOPE * x)


def critic_kernel(s_ref, a_ref,
                  w1_ref, b1_ref,
                  w2s_ref, w2a_ref, b2_ref,
                  w3_ref, b3_ref,
                  o_ref):
    # l1: xs = leaky_relu(state @ W1 + b1)   (f32 accumulation on the MXU)
    xs = jnp.dot(s_ref[...], w1_ref[...], preferred_element_type=jnp.float32)
    xs = _leaky_relu(xs + b1_ref[...])

    # l2 on concat(xs, action): split-weight formulation (no concat needed).
    z2 = (jnp.dot(xs, w2s_ref[...], preferred_element_type=jnp.float32)
          + jnp.dot(a_ref[...], w2a_ref[...], preferred_element_type=jnp.float32)
          + b2_ref[...])
    x = _leaky_relu(z2)                                   # (tb, L2) f32

    # l3 head: (1, L2) @ x.T on the MXU -> lane-dense (1, tb) row, then a single
    # dense store.  No (tb, 1) column, no masked partial stores.
    tb = x.shape[0]
    row = jnp.dot(w3_ref[...], x.T,
                  preferred_element_type=jnp.float32) + b3_ref[...]   # (1, tb)
    o_ref[...] = row.reshape(1, 1, tb).astype(o_ref.dtype)


def prepare_params(params):
    """One-time weight preprocessing (hoisted out of the per-call path)."""
    w1, b1, w2, b2, w3, b3 = (params[k] for k in ("w1", "b1", "w2", "b2", "w3", "b3"))
    f32 = jnp.float32
    w2_t = w2.T.astype(f32)                      # (L1 + action_size, L2)
    return {
        "w1_t": w1.T.astype(f32),                # (state_size, L1)
        "b1":   b1[None, :].astype(f32),         # (1, L1)
        "w2s":  w2_t[:L1_SIZE, :],               # (L1, L2)           multiplies xs
        "w2a":  w2_t[L1_SIZE:, :],               # (action_size, L2)  multiplies action
        "b2":   b2[None, :].astype(f32),         # (1, L2)
        "w3":   w3.astype(f32),                  # (1, L2)
        "b3":   b3[None, :].astype(f32),         # (1, 1)
    }


def critic_forward(state, action, prepped, *, block_b=4096,
                   vmem_limit_bytes=48 * 1024 * 1024):
    """state: (B, state_size), action: (B, action_size) -> (B, 1) float32."""
    B, state_size = state.shape
    action_size = action.shape[1]

    if state.dtype != jnp.float32:
        state = state.astype(jnp.float32)
    if action.dtype != jnp.float32:
        action = action.astype(jnp.float32)

    # Batch tile: big enough to amortize per-step overhead, 8-aligned on the
    # sublane axis whenever it does not cover the whole batch.
    if block_b >= B:
        tb = B
    else:
        tb = max(8, (block_b // 8) * 8)
    num_tiles = pl.cdiv(B, tb)
    grid = (num_tiles,)

    def resident(arr):  # weights/biases: same block every step -> stay in VMEM
        return pl.BlockSpec(arr.shape, lambda i: (0,) * arr.ndim)

    in_specs = [
        pl.BlockSpec((tb, state_size), lambda i: (i, 0)),
        pl.BlockSpec((tb, action_size), lambda i: (i, 0)),
        resident(prepped["w1_t"]), resident(prepped["b1"]),
        resident(prepped["w2s"]), resident(prepped["w2a"]), resident(prepped["b2"]),
        resident(prepped["w3"]), resident(prepped["b3"]),
    ]
    # Lane-dense output slab: (num_tiles, 1, tb), one dense row per grid step.
    out_specs = pl.BlockSpec((1, 1, tb), lambda i: (i, 0, 0))

    out_slab = pl.pallas_call(
        critic_kernel,
        out_shape=jax.ShapeDtypeStruct((num_tiles, 1, tb), jnp.float32),
        grid=grid,
        in_specs=in_specs,
        out_specs=out_specs,
        compiler_params=pltpu.CompilerParams(
            dimension_semantics=("parallel",),       # megacore sharding on v7x
            vmem_limit_bytes=vmem_limit_bytes),
    )(state, action,
      prepped["w1_t"], prepped["b1"],
      prepped["w2s"], prepped["w2a"], prepped["b2"],
      prepped["w3"], prepped["b3"])

    # Slab -> (B, 1); drops the garbage rows of a partial final tile.
    return out_slab.reshape(-1)[:B].reshape(B, 1)


def init_params(key, state_size, action_size):
    """Deterministic synthetic init mirroring Critic.__init__/reset_parameters."""
    ks = jax.random.split(key, 6)

    def u(k, shape, lo, hi):
        return jax.random.uniform(k, shape, jnp.float32, lo, hi)

    # weights: uniform_(-0.003, 0.003); biases keep PyTorch Linear default
    # U(-1/sqrt(fan_in), 1/sqrt(fan_in)).
    w1 = u(ks[0], (L1_SIZE, state_size), -0.003, 0.003)
    b1 = u(ks[1], (L1_SIZE,), -1.0 / state_size ** 0.5, 1.0 / state_size ** 0.5)
    fan2 = L1_SIZE + action_size
    w2 = u(ks[2], (L2_SIZE, fan2), -0.003, 0.003)
    b2 = u(ks[3], (L2_SIZE,), -1.0 / fan2 ** 0.5, 1.0 / fan2 ** 0.5)
    w3 = u(ks[4], (1, L2_SIZE), -0.003, 0.003)
    b3 = u(ks[5], (1,), -1.0 / L2_SIZE ** 0.5, 1.0 / L2_SIZE ** 0.5)
    return {"w1": w1, "b1": b1, "w2": w2, "b2": b2, "w3": w3, "b3": b3}


def critic_reference(state, action, p):
    xs = _leaky_relu(state @ p["w1"].T + p["b1"])
    x = jnp.concatenate([xs, action], axis=1)
    x = _leaky_relu(x @ p["w2"].T + p["b2"])
    return x @ p["w3"].T + p["b3"]


if __name__ == "__main__":
    STATE_SIZE, ACTION_SIZE = 16, 4
    key = jax.random.PRNGKey(0)
    k_s, k_a, k_p = jax.random.split(key, 3)
    params = init_params(k_p, STATE_SIZE, ACTION_SIZE)
    prepped = prepare_params(params)          # weight prep hoisted: done once

    fwd = jax.jit(critic_forward,
                  static_argnames=("block_b", "vmem_limit_bytes"))

    # 1) small batch, single grid step
    B = 8
    state = jax.random.normal(k_s, (B, STATE_SIZE), jnp.float32)
    action = jax.random.normal(k_a, (B, ACTION_SIZE), jnp.float32)
    out = jax.block_until_ready(fwd(state, action, prepped))
    ref = critic_reference(state, action, params)
    assert out.shape == (B, 1), out.shape
    assert jnp.allclose(out, ref, atol=1e-5, rtol=1e-4), (out, ref)

    # 2) multi-step grid with a partial final block (exercises tiling + slab slice)
    B2 = 300
    state2 = jax.random.normal(k_s, (B2, STATE_SIZE), jnp.float32)
    action2 = jax.random.normal(k_a, (B2, ACTION_SIZE), jnp.float32)
    out2 = jax.block_until_ready(fwd(state2, action2, prepped, block_b=128))
    ref2 = critic_reference(state2, action2, params)
    assert out2.shape == (B2, 1), out2.shape
    assert jnp.allclose(out2, ref2, atol=1e-5, rtol=1e-4)

    # 3) default large-tile path: 2 grid steps (both TensorCores get work on v7x)
    B3 = 8192
    state3 = jax.random.normal(k_s, (B3, STATE_SIZE), jnp.float32)
    action3 = jax.random.normal(k_a, (B3, ACTION_SIZE), jnp.float32)
    out3 = jax.block_until_ready(fwd(state3, action3, prepped))
    ref3 = critic_reference(state3, action3, params)
    assert out3.shape == (B3, 1), out3.shape
    assert jnp.allclose(out3, ref3, atol=1e-5, rtol=1e-4)

    print("KERNEL_OK")
</pallas_src>

<mosaic_0001>
module attributes {stable_mosaic.version = 11 : i64} {
  func.func @critic_kernel(%arg0: i32, %arg1: memref<8x16xf32, #tpu.memory_space<vmem>>, %arg2: memref<8x4xf32, #tpu.memory_space<vmem>>, %arg3: memref<16x20xf32, #tpu.memory_space<vmem>>, %arg4: memref<1x20xf32, #tpu.memory_space<vmem>>, %arg5: memref<20x10xf32, #tpu.memory_space<vmem>>, %arg6: memref<4x10xf32, #tpu.memory_space<vmem>>, %arg7: memref<1x10xf32, #tpu.memory_space<vmem>>, %arg8: memref<1x10xf32, #tpu.memory_space<vmem>>, %arg9: memref<1x1xf32, #tpu.memory_space<vmem>>, %arg10: memref<1x1x8xf32, #tpu.memory_space<vmem>>) attributes {dimension_semantics = [#tpu.dimension_semantics<parallel>], iteration_bounds = array<i64: 1>, scalar_prefetch = 0 : i64, scratch_operands = 0 : i64, tpu.core_type = #tpu.core_type<tc>, window_params = [{transform_indices = @transform_0, window_bounds = array<i64: 8, 16>}, {transform_indices = @transform_1, window_bounds = array<i64: 8, 4>}, {pipeline_mode = #tpu.pipeline_mode<synchronous>, transform_indices = @transform_2, window_bounds = array<i64: 16, 20>}, {pipeline_mode = #tpu.pipeline_mode<synchronous>, transform_indices = @transform_3, window_bounds = array<i64: 1, 20>}, {pipeline_mode = #tpu.pipeline_mode<synchronous>, transform_indices = @transform_4, window_bounds = array<i64: 20, 10>}, {pipeline_mode = #tpu.pipeline_mode<synchronous>, transform_indices = @transform_5, window_bounds = array<i64: 4, 10>}, {pipeline_mode = #tpu.pipeline_mode<synchronous>, transform_indices = @transform_6, window_bounds = array<i64: 1, 10>}, {pipeline_mode = #tpu.pipeline_mode<synchronous>, transform_indices = @transform_7, window_bounds = array<i64: 1, 10>}, {pipeline_mode = #tpu.pipeline_mode<synchronous>, transform_indices = @transform_8, window_bounds = array<i64: 1, 1>}, {transform_indices = @transform_9, window_bounds = array<i64: 1, 1, 8>}]} {
    %c0 = arith.constant 0 : index
    %c0_0 = arith.constant 0 : index
    %0 = vector.load %arg1[%c0, %c0_0] : memref<8x16xf32, #tpu.memory_space<vmem>>, vector<8x16xf32>
    %c0_1 = arith.constant 0 : index
    %c0_2 = arith.constant 0 : index
    %1 = vector.load %arg3[%c0_1, %c0_2] : memref<16x20xf32, #tpu.memory_space<vmem>>, vector<16x20xf32>
    %cst = arith.constant dense<0.000000e+00> : vector<8x20xf32>
    %2 = tpu.matmul %0, %1, %cst {dimension_numbers = #tpu.dot_dimension_numbers<[1], [0], [0], [1], [0, 0, 1, 1], [], []>} : vector<8x16xf32>, vector<16x20xf32>, vector<8x20xf32> -> vector<8x20xf32>
    %c0_3 = arith.constant 0 : index
    %c0_4 = arith.constant 0 : index
    %3 = vector.load %arg4[%c0_3, %c0_4] : memref<1x20xf32, #tpu.memory_space<vmem>>, vector<1x20xf32>
    %4 = vector.broadcast %3 : vector<1x20xf32> to vector<8x20xf32>
    %5 = arith.addf %2, %4 : vector<8x20xf32>
    %cst_5 = arith.constant 0.000000e+00 : f32
    %6 = vector.broadcast %cst_5 : f32 to vector<8x20xf32>
    %7 = arith.cmpf ogt, %5, %6 : vector<8x20xf32>
    %cst_6 = arith.constant 0.00999999977 : f32
    %8 = vector.broadcast %cst_6 : f32 to vector<8x20xf32>
    %9 = arith.mulf %8, %5 : vector<8x20xf32>
    %10 = arith.select %7, %5, %9 : vector<8x20xi1>, vector<8x20xf32>
    %c0_7 = arith.constant 0 : index
    %c0_8 = arith.constant 0 : index
    %11 = vector.load %arg5[%c0_7, %c0_8] : memref<20x10xf32, #tpu.memory_space<vmem>>, vector<20x10xf32>
    %cst_9 = arith.constant dense<0.000000e+00> : vector<8x10xf32>
    %12 = tpu.matmul %10, %11, %cst_9 {dimension_numbers = #tpu.dot_dimension_numbers<[1], [0], [0], [1], [0, 0, 1, 1], [], []>} : vector<8x20xf32>, vector<20x10xf32>, vector<8x10xf32> -> vector<8x10xf32>
    %c0_10 = arith.constant 0 : index
    %c0_11 = arith.constant 0 : index
    %13 = vector.load %arg2[%c0_10, %c0_11] : memref<8x4xf32, #tpu.memory_space<vmem>>, vector<8x4xf32>
    %c0_12 = arith.constant 0 : index
    %c0_13 = arith.constant 0 : index
    %14 = vector.load %arg6[%c0_12, %c0_13] : memref<4x10xf32, #tpu.memory_space<vmem>>, vector<4x10xf32>
    %cst_14 = arith.constant dense<0.000000e+00> : vector<8x10xf32>
    %15 = tpu.matmul %13, %14, %cst_14 {dimension_numbers = #tpu.dot_dimension_numbers<[1], [0], [0], [1], [0, 0, 1, 1], [], []>} : vector<8x4xf32>, vector<4x10xf32>, vector<8x10xf32> -> vector<8x10xf32>
    %16 = arith.addf %12, %15 : vector<8x10xf32>
    %c0_15 = arith.constant 0 : index
    %c0_16 = arith.constant 0 : index
    %17 = vector.load %arg7[%c0_15, %c0_16] : memref<1x10xf32, #tpu.memory_space<vmem>>, vector<1x10xf32>
    %18 = vector.broadcast %17 : vector<1x10xf32> to vector<8x10xf32>
    %19 = arith.addf %16, %18 : vector<8x10xf32>
    %cst_17 = arith.constant 0.000000e+00 : f32
    %20 = vector.broadcast %cst_17 : f32 to vector<8x10xf32>
    %21 = arith.cmpf ogt, %19, %20 : vector<8x10xf32>
    %cst_18 = arith.constant 0.00999999977 : f32
    %22 = vector.broadcast %cst_18 : f32 to vector<8x10xf32>
    %23 = arith.mulf %22, %19 : vector<8x10xf32>
    %24 = arith.select %21, %19, %23 : vector<8x10xi1>, vector<8x10xf32>
    %c0_19 = arith.constant 0 : index
    %c0_20 = arith.constant 0 : index
    %25 = vector.load %arg8[%c0_19, %c0_20] : memref<1x10xf32, #tpu.memory_space<vmem>>, vector<1x10xf32>
    %26 = tpu.transpose %24, [1, 0] : vector<8x10xf32> -> vector<10x8xf32>
    %cst_21 = arith.constant dense<0.000000e+00> : vector<1x8xf32>
    %27 = tpu.matmul %25, %26, %cst_21 {dimension_numbers = #tpu.dot_dimension_numbers<[1], [0], [0], [1], [0, 0, 1, 1], [], []>} : vector<1x10xf32>, vector<10x8xf32>, vector<1x8xf32> -> vector<1x8xf32>
    %c0_22 = arith.constant 0 : index
    %c0_23 = arith.constant 0 : index
    %28 = vector.load %arg9[%c0_22, %c0_23] : memref<1x1xf32, #tpu.memory_space<vmem>>, vector<1x1xf32>
    %29 = vector.broadcast %28 : vector<1x1xf32> to vector<1x8xf32>
    %30 = arith.addf %27, %29 : vector<1x8xf32>
    %31 = vector.shape_cast %30 : vector<1x8xf32> to vector<1x1x8xf32>
    %c0_24 = arith.constant 0 : index
    %c0_25 = arith.constant 0 : index
    %c0_26 = arith.constant 0 : index
    %32 = vector.load %arg10[%c0_24, %c0_25, %c0_26] : memref<1x1x8xf32, #tpu.memory_space<vmem>>, vector<1x1x8xf32>
    tpu.vector_store %arg10[%c0_24, %c0_25, %c0_26], %31 {strides = array<i32>} : memref<1x1x8xf32, #tpu.memory_space<vmem>>, vector<1x1x8xf32>,
    return
  }
  func.func @transform_0(%arg0: i32) -> (i32, i32) {
    %c0_i32 = arith.constant 0 : i32
    %c0_i32_0 = arith.constant 0 : i32
    return %arg0, %c0_i32 : i32, i32
  }
  func.func @transform_1(%arg0: i32) -> (i32, i32) {
    %c0_i32 = arith.constant 0 : i32
    %c0_i32_0 = arith.constant 0 : i32
    return %arg0, %c0_i32 : i32, i32
  }
  func.func @transform_2(%arg0: i32) -> (i32, i32) {
    %c0_i32 = arith.constant 0 : i32
    %c0_i32_0 = arith.constant 0 : i32
    %c0_i32_1 = arith.constant 0 : i32
    return %c0_i32, %c0_i32_0 : i32, i32
  }
  func.func @transform_3(%arg0: i32) -> (i32, i32) {
    %c0_i32 = arith.constant 0 : i32
    %c0_i32_0 = arith.constant 0 : i32
    %c0_i32_1 = arith.constant 0 : i32
    return %c0_i32, %c0_i32_0 : i32, i32
  }
  func.func @transform_4(%arg0: i32) -> (i32, i32) {
    %c0_i32 = arith.constant 0 : i32
    %c0_i32_0 = arith.constant 0 : i32
    %c0_i32_1 = arith.constant 0 : i32
    return %c0_i32, %c0_i32_0 : i32, i32
  }
  func.func @transform_5(%arg0: i32) -> (i32, i32) {
    %c0_i32 = arith.constant 0 : i32
    %c0_i32_0 = arith.constant 0 : i32
    %c0_i32_1 = arith.constant 0 : i32
    return %c0_i32, %c0_i32_0 : i32, i32
  }
  func.func @transform_6(%arg0: i32) -> (i32, i32) {
    %c0_i32 = arith.constant 0 : i32
    %c0_i32_0 = arith.constant 0 : i32
    %c0_i32_1 = arith.constant 0 : i32
    return %c0_i32, %c0_i32_0 : i32, i32
  }
  func.func @transform_7(%arg0: i32) -> (i32, i32) {
    %c0_i32 = arith.constant 0 : i32
    %c0_i32_0 = arith.constant 0 : i32
    %c0_i32_1 = arith.constant 0 : i32
    return %c0_i32, %c0_i32_0 : i32, i32
  }
  func.func @transform_8(%arg0: i32) -> (i32, i32) {
    %c0_i32 = arith.constant 0 : i32
    %c0_i32_0 = arith.constant 0 : i32
    %c0_i32_1 = arith.constant 0 : i32
    return %c0_i32, %c0_i32_0 : i32, i32
  }
  func.func @transform_9(%arg0: i32) -> (i32, i32, i32) {
    %c0_i32 = arith.constant 0 : i32
    %c0_i32_0 = arith.constant 0 : i32
    %c0_i32_1 = arith.constant 0 : i32
    return %arg0, %c0_i32, %c0_i32_0 : i32, i32, i32
  }
}

</mosaic_0001>

<bundles_post_ra>
// kernel: critic_forward.1
= control target key start
LH: loop header
LB: loop body
LE: loop exit
PB: predicated region body
PF: predicated region fallthrough
CT: control target
= control target key end

     0   :  { %s569_s0 = inlined_call_operand.vmem [shape: f32[8,16], index: 0, kind: input, shape index: {}]   ;;  %s570_s1 = inlined_call_operand.vmem [shape: f32[8,4], index: 1, kind: input, shape index: {}]   ;;  %s571_s2 = inlined_call_operand.vmem [shape: f32[16,20], index: 2, kind: input, shape index: {}]   ;;  %s572_s3 = inlined_call_operand.vmem [shape: f32[1,20], index: 3, kind: input, shape index: {}]   ;;  %s573_s4 = inlined_call_operand.vmem [shape: f32[20,10], index: 4, kind: input, shape index: {}]   ;;  %s574_s5 = inlined_call_operand.vmem [shape: f32[4,10], index: 5, kind: input, shape index: {}]   ;;  %s575_s6 = inlined_call_operand.vmem [shape: f32[1,10], index: 6, kind: input, shape index: {}]   ;;  %s576_s7 = inlined_call_operand.vmem [shape: f32[1,10], index: 7, kind: input, shape index: {}]   ;;  %s577_s8 = inlined_call_operand.<no memory space> [shape: f32[1,1], index: 8, kind: input, shape index: {}]   ;;  %s578_s9 = inlined_call_operand.hbm [shape: f32[1,1,8], index: 9, kind: output, shape index: {}]  }
   0x1   :  { %v14_v0 = vstv %s577_s8 }
   0x2   :  { %15 = vst [vmem:[#allocation2] sm:$0x1] %v14_v0 }
   0x3   :  { %v37_v1 = vld [vmem:[%s571_s2 + $0x8] sm:$0xff]  ;;  %v470_v2 = vmov 0.0   ;;  %v36_v3 = vld [vmem:[%s571_s2] sm:$0xff]  ;;  %vm471_vm0 = vmmov 0   ;;  %vm131_vm1 = vcmask 1043456   ;;  %vm45_vm2 = vcmask 130048  }
   0x4   :  { %417 = vmatprep.subr.mxu0 %v470_v2  ;;  %421 = vmatprep.mubr.msk.f32.mxu0 %vm471_vm0, %v470_v2  ;;  %v126_v4 = vld [vmem:[%s574_s5] sm:$0xf]  ;;  %vm127_vm3 = vcmask 31744  }
   0x5   :  { %418 = vmatpush3.msra.mxu0 %v37_v1  ;;  %v35_v5 = vld [vmem:[%s569_s0] sm:$0xff]  ;;  %424 = vmatprep.subr.mxu1 %v470_v2 }
   0x6   :  { %v125_v6 = vld [vmem:[%s570_s1] sm:$0xff] }
   0x7   :  { %16 = vsyncpa [#allocation4], 0  ;;  %419 = vmatprep.subr.mxu0 %v470_v2  ;;  %425 = vmatpush3.msk.msra.mxu1 %vm131_vm1, %v126_v4  ;;  %v124_v7 = vld [vmem:[%s573_s4 + $0x10] sm:$0xf]  ;;  %v123_v8 = vld [vmem:[%s573_s4 + $0x8] sm:$0xff]  ;;  %vm205_vm5 = vcmask 162816   ;;  %v300_v28 = vlaneseq }
   0x8   :  { %420 = vmatpush3.msra.mxu0 %v36_v3  ;;  %426 = vmatprep.mubr.msk.f32.mxu1 %vm471_vm0, %v470_v2  ;;  %v122_v9 = vld [vmem:[%s573_s4] sm:$0xff]  ;;  %v472_v19 = vmov 0   ;;  %vm304_vm7 = vcmask 80896   ;;  %s473_s26 = smov [#allocation3]   ;;  %vm381_vm8 = vcmask 57344  }
   0x9   :  { %422 = vmatmul.mubr.msk.f32.vlgmr.msra.gmra.mxu0 %vm45_vm2, %v35_v5  ;;  %427 = vmatmul.mubr.msk.f32.vlgmr.msra.gmra.mxu1 %vm127_vm3, %v125_v6  ;;  %v397_v10 = vld [vmem:[%s572_s3] ss:$0 sm:$0xff]  ;;  %v301_v29 = vshrl.u32 %v300_v28, 7 }
   0xa   :  { %429 = vmatprep.subr.mxu1 %v470_v2  ;;  %435 = vmatprep.mubr.msk.f32.mxu1 %vm471_vm0, %v470_v2  ;;  %v294_v18 = vld [vmem:[#allocation2] sm:$0x1] }
   0xb   :  { %438 = vmatprep.subr.mxu0 %v470_v2  ;;  %440 = vmatprep.mubr.msk.f32.mxu0 %vm471_vm0, %v470_v2  ;;  %v403_v21 = vld [vmem:[%s575_s6] ss:$0 sm:$0xff]  ;;  %v302_v30 = vsub.s32 0, %v301_v29  ;;  %s389_s6 = sshll.u32 %s473_s26, 4  ;;  %s390_s6 = int_to_ptr.vmem [resolvable:$true] %s389_s6 }
   0xc   :  { %430 = vmatpush3.msk.msra.mxu1 %vm131_vm1, %v124_v7  ;;  %447 = vset.pattern.permute.xlu0 %v472_v19  ;;  %v293_v27 = vld [vmem:[%s576_s7] sm:$0x1]  ;;  %s448_s27 = scalar_lea.vmem %s390_s6, 16  ;;  %s452_s28 = scalar_lea.vmem %s390_s6, 32 }
   0xd   :  { %431 = vmatprep.subr.mxu1 %v470_v2  ;;  %297 = vperm.xlu0 %447, %v294_v18   ;;  %p449_p0 = scmp.ne.s32.totalorder %s390_s6, %s448_s27  ;;  %p453_p1 = scmp.lt.s32.totalorder %s390_s6, %s390_s6 }
   0xe   :  { %432 = vmatpush3.msra.mxu1 %v123_v8  ;;  %p454_p2 = scmp.lt.s32.totalorder %s452_s28, %s448_s27 }
   0xf   :  { %433 = vmatprep.subr.mxu1 %v470_v2 }
  0x10   :  { %434 = vmatpush3.msra.mxu1 %v122_v9  ;;  %p455_p3 = por %p454_p2, %p453_p1 }
  0x12   :  { %p456_p4 = pnand %p455_p3, %p449_p0 }
  0x88   :  { %v298_v31 = vpop.permute.xlu0 %297 }
  0x89   :  { %v303_v32 = vrot.slane %v298_v31, %v302_v30 }
  0xc9   :  { %v115_v11 = vpop.f32.mrf.mxu0  ;;  %v201_v12 = vpop.f32.mrf.mxu1 }
  0xca   :  { %v116_v13 = vadd.f32 %v397_v10, %v115_v11 }
  0xcb   :  { %v423_v14 = vpop.f32.mrf.mxu0  ;;  %v428_v15 = vpop.f32.mrf.mxu1 }
  0xcc   :  { %vm119_vm4 = vcmp.gt.f32.partialorder %v116_v13, 0.0  ;;  %v120_v16 = vmul.f32 0.01, %v116_v13 }
  0xce   :  { %v121_v17 = vsel %vm119_vm4, %v116_v13, %v120_v16 }
  0xcf   :  { %436 = vmatmul.mubr.msk.f32.vlgmr.msra.gmra.mxu1 %vm205_vm5, %v121_v17 }
 0x18f   :  { %v278_v20 = vpop.f32.mrf.mxu1 }
 0x190   :  { %v279_v22 = vadd.f32 %v278_v20, %v201_v12 }
 0x191   :  { %v437_v23 = vpop.f32.mrf.mxu1 }
 0x192   :  { %v289_v24 = vadd.f32 %v403_v21, %v279_v22 }
 0x194   :  { %vm290_vm6 = vcmp.gt.f32.partialorder %v289_v24, 0.0  ;;  %v291_v25 = vmul.f32 0.01, %v289_v24 }
 0x196   :  { %v292_v26 = vsel %vm290_vm6, %v289_v24, %v291_v25 }
 0x197   :  { %439 = vmatpush3.xpose.msk.msra.mxu0 %vm304_vm7, %v292_v26 }
 0x19a   :  { %441 = vmatmul.mubr.msk.f32.vlgmr.msra.gmra.mxu0 %vm304_vm7, %v293_v27 }
 0x25a   :  { %v377_v33 = vpop.f32.mrf.mxu0 }
 0x25b   :  { %v378_v34 = vadd.f32 %v377_v33, %v303_v32 }
 0x25c   :  { %v442_v35 = vpop.f32.mrf.mxu0 }
 0x25d   :  { %382 = vst.msk [vmem:[#allocation3] sm:$0x1] %vm381_vm8, %v378_v34 }
 0x25e   :  { %459 = shalt.err (!%p456_p4)
}
 0x25f   :  { %392 = dma.vmem_to_hbm [thread:$0]  %s390_s6, 16, %s578_s9, [#allocation4]  }
 0x260   :  { %468 = dma.done.wait [#allocation4], 16  }
 0x261   :  { %469 = vsyncadd [#allocation4], 4294967280 }
 0x262   :  { %396 = vsyncpa [#allocation4], 1 }

</bundles_post_ra>
